<compile_context>
chip_gen: v7x
topology: tpu7x:2x2x1
jax: 0.10.0
libtpu: 0.0.40
codegen_flags: <defaults>
</compile_context>

<pallas_src>
import functools
import math

import jax
import jax.numpy as jnp
from jax.experimental import pallas as pl
from jax.experimental.pallas import tpu as pltpu


def _round_up(x: int, m: int) -> int:
    return (x + m - 1) // m * m


def _choose_layout(n_elem: int):
    """Pick a lane-dense (rows, lane) slab layout and a row tile for it."""
    lane = 128
    for cand in (1024, 512, 256, 128):
        if n_elem % cand == 0:
            lane = cand
            break
    total = _round_up(max(n_elem, 1), lane)
    rows = total // lane

    # ~4 MiB of f32 per operand per tile: 3-4 operands x 2 buffers stays
    # <= ~32 MiB, safe on v7x's 64 MiB VMEM and under the 48 MiB limit below.
    cap = max(8, (4 << 20) // (4 * lane))          # multiple of 8 by construction
    if rows <= cap:
        if rows >= 16 and rows % 16 == 0:
            row_tile = rows // 2                   # >=2 grid steps -> both v7x TCs
        else:
            row_tile = rows                        # single full-extent block
    else:
        row_tile = cap
    return lane, rows, row_tile


def _em_step_kernel(*refs, add_noise: bool):
    """out = c1*x + c2*score (+ c3*z) on one lane-dense (row_tile, lane) block.

    coef_ref: SMEM f32[3] = (c1, c2, c3).  Compute in f32, store in out dtype.
    """
    if add_noise:
        coef_ref, x_ref, score_ref, z_ref, out_ref = refs
    else:
        coef_ref, x_ref, score_ref, out_ref = refs
        z_ref = None

    c1 = coef_ref[0]
    c2 = coef_ref[1]

    x = x_ref[...].astype(jnp.float32)
    s = score_ref[...].astype(jnp.float32)
    y = c1 * x + c2 * s

    if add_noise:
        c3 = coef_ref[2]
        y = y + c3 * z_ref[...].astype(jnp.float32)

    out_ref[...] = y.astype(out_ref.dtype)


def diffusion_reverse_step(inputs, score, beta_schedule, time_step,
                           noise_scale=0.0, rng_key=None):
    """x_{t-1} = EulerMaruyamaStep(x_t, score) using a Pallas TPU kernel.

    `inputs` / `score` may be any shape (e.g. (N, score_dim)); they are viewed
    as a lane-dense slab for the kernel and reshaped back.  `noise_scale` must
    be a static Python scalar (it selects the kernel variant at trace time).
    """
    assert inputs.shape == score.shape
    add_noise = float(noise_scale) != 0.0          # requires a static scalar

    orig_shape = inputs.shape
    dtype = inputs.dtype
    n_elem = math.prod(orig_shape) if orig_shape else 1

    lane, rows, row_tile = _choose_layout(n_elem)
    total = rows * lane
    pad = total - n_elem

    def to_slab(a):
        flat = a.reshape(-1)
        if pad:                                    # only for ragged sizes
            flat = jnp.pad(flat, (0, pad))
        return flat.reshape(rows, lane)

    x_slab = to_slab(inputs)
    s_slab = to_slab(score)

    # Scalar coefficients, computed once outside the hot loop (SMEM f32[3]).
    dt = 1.0 / beta_schedule.shape[0]
    beta_t = beta_schedule.astype(jnp.float32)[time_step]
    c1 = 1.0 + 0.5 * beta_t * dt
    c2 = beta_t * dt
    c3 = noise_scale * jnp.sqrt(beta_t * dt)
    coef = jnp.stack([c1, c2, c3]).astype(jnp.float32)

    vmem_spec = pl.BlockSpec((row_tile, lane), lambda i: (i, 0))
    in_specs = [pl.BlockSpec(memory_space=pltpu.SMEM), vmem_spec, vmem_spec]
    operands = [coef, x_slab, s_slab]

    if add_noise:
        if rng_key is None:
            rng_key = jax.random.PRNGKey(0)
        # TODO(synk): replace with in-kernel pltpu.prng_seed/stateful_normal on
        # real TPU hardware (interpret path lacks prng_seed lowering).
        z_slab = jax.random.normal(rng_key, (rows, lane), dtype=jnp.float32)
        in_specs.append(vmem_spec)
        operands.append(z_slab)

    grid = (pl.cdiv(rows, row_tile),)
    kernel = functools.partial(_em_step_kernel, add_noise=add_noise)

    out_slab = pl.pallas_call(
        kernel,
        out_shape=jax.ShapeDtypeStruct((rows, lane), dtype),
        grid_spec=pltpu.PrefetchScalarGridSpec(
            num_scalar_prefetch=0,
            grid=grid,
            in_specs=in_specs,
            out_specs=vmem_spec,
        ),
        compiler_params=pltpu.CompilerParams(
            dimension_semantics=("parallel",),
            vmem_limit_bytes=48 * 1024 * 1024,
        ),
    )(*operands)

    if pad:
        out = out_slab.reshape(-1)[:n_elem].reshape(orig_shape)
    else:
        out = out_slab.reshape(orig_shape)
    return out


if __name__ == "__main__":
    # Deterministic synthetic parameters (no checkpoint).
    T = 8                                   # diffusion steps
    score_dim = 3
    beta_schedule = jnp.linspace(1e-4, 2e-2, T, dtype=jnp.float32)
    time_step = 3

    key = jax.random.PRNGKey(0)
    k_x, k_s, k_z = jax.random.split(key, 3)
    N = 128                                 # number of 3-D coordinates
    x = jax.random.normal(k_x, (N, score_dim), dtype=jnp.float32)
    score = jax.random.normal(k_s, (N, score_dim), dtype=jnp.float32)

    dt = 1.0 / T
    beta_t = beta_schedule[time_step]
    det_ref = x + beta_t * (0.5 * x + score) * dt   # drift-only reference

    # 1) Module default noise_scale = 0.0: exact match against the reference.
    out0 = jax.block_until_ready(
        diffusion_reverse_step(x, score, beta_schedule, time_step,
                               noise_scale=0.0))
    assert out0.dtype == x.dtype and out0.shape == x.shape
    assert jnp.allclose(out0, det_ref, atol=1e-6, rtol=1e-6)

    # 2) noise_scale = 1.0: noise streamed from the wrapper RNG; check the
    #    recovered z = (out - drift)/c3 is finite and ~ N(0, 1) statistically.
    noise_scale = 1.0
    out1 = jax.block_until_ready(
        diffusion_reverse_step(x, score, beta_schedule, time_step,
                               noise_scale=noise_scale, rng_key=k_z))
    c3 = noise_scale * jnp.sqrt(beta_t * dt)
    z_rec = (out1 - det_ref) / c3
    assert jnp.all(jnp.isfinite(out1))
    assert abs(float(jnp.mean(z_rec))) < 0.2
    assert 0.8 < float(jnp.std(z_rec)) < 1.2

    print("KERNEL_OK")
</pallas_src>

<mosaic_0001>
module attributes {stable_mosaic.version = 11 : i64} {
  func.func @_em_step_kernel(%arg0: i32, %arg1: memref<3xf32, #tpu.memory_space<smem>>, %arg2: memref<3x128xf32, #tpu.memory_space<vmem>>, %arg3: memref<3x128xf32, #tpu.memory_space<vmem>>, %arg4: memref<3x128xf32, #tpu.memory_space<vmem>>) attributes {dimension_semantics = [#tpu.dimension_semantics<parallel>], iteration_bounds = array<i64: 1>, scalar_prefetch = 0 : i64, scratch_operands = 0 : i64, tpu.core_type = #tpu.core_type<tc>, window_params = [{transform_indices = @transform_0, window_bounds = array<i64: 3>}, {transform_indices = @transform_1, window_bounds = array<i64: 3, 128>}, {transform_indices = @transform_2, window_bounds = array<i64: 3, 128>}, {transform_indices = @transform_3, window_bounds = array<i64: 3, 128>}]} {
    %c0 = arith.constant 0 : index
    %0 = memref.load %arg1[%c0] : memref<3xf32, #tpu.memory_space<smem>>
    %c1 = arith.constant 1 : index
    %1 = memref.load %arg1[%c1] : memref<3xf32, #tpu.memory_space<smem>>
    %c0_0 = arith.constant 0 : index
    %c0_1 = arith.constant 0 : index
    %2 = vector.load %arg2[%c0_0, %c0_1] : memref<3x128xf32, #tpu.memory_space<vmem>>, vector<3x128xf32>
    %c0_2 = arith.constant 0 : index
    %c0_3 = arith.constant 0 : index
    %3 = vector.load %arg3[%c0_2, %c0_3] : memref<3x128xf32, #tpu.memory_space<vmem>>, vector<3x128xf32>
    %4 = vector.broadcast %0 : f32 to vector<3x128xf32>
    %5 = arith.mulf %4, %2 : vector<3x128xf32>
    %6 = vector.broadcast %1 : f32 to vector<3x128xf32>
    %7 = arith.mulf %6, %3 : vector<3x128xf32>
    %8 = arith.addf %5, %7 : vector<3x128xf32>
    %c0_4 = arith.constant 0 : index
    %c0_5 = arith.constant 0 : index
    %9 = vector.load %arg4[%c0_4, %c0_5] : memref<3x128xf32, #tpu.memory_space<vmem>>, vector<3x128xf32>
    tpu.vector_store %arg4[%c0_4, %c0_5], %8 {strides = array<i32>} : memref<3x128xf32, #tpu.memory_space<vmem>>, vector<3x128xf32>,
    return
  }
  func.func @transform_0(%arg0: i32) -> i32 {
    %c0_i32 = arith.constant 0 : i32
    %c0_i32_0 = arith.constant 0 : i32
    return %c0_i32 : i32
  }
  func.func @transform_1(%arg0: i32) -> (i32, i32) {
    %c0_i32 = arith.constant 0 : i32
    %c0_i32_0 = arith.constant 0 : i32
    return %arg0, %c0_i32 : i32, i32
  }
  func.func @transform_2(%arg0: i32) -> (i32, i32) {
    %c0_i32 = arith.constant 0 : i32
    %c0_i32_0 = arith.constant 0 : i32
    return %arg0, %c0_i32 : i32, i32
  }
  func.func @transform_3(%arg0: i32) -> (i32, i32) {
    %c0_i32 = arith.constant 0 : i32
    %c0_i32_0 = arith.constant 0 : i32
    return %arg0, %c0_i32 : i32, i32
  }
}

</mosaic_0001>

<bundles_post_ra>
// kernel: tpu_custom_call.1
= control target key start
LH: loop header
LB: loop body
LE: loop exit
PB: predicated region body
PF: predicated region fallthrough
CT: control target
= control target key end

     0   :  { %8 = vsyncpa [#allocation5], 0  ;;  %s190_s0 = inlined_call_operand.hbm [shape: f32[3], index: 0, kind: input, shape index: {}]   ;;  %s191_s1 = inlined_call_operand.hbm [shape: f32[3,128], index: 1, kind: input, shape index: {}]   ;;  %s192_s2 = inlined_call_operand.vmem [shape: f32[3,128], index: 2, kind: input, shape index: {}]   ;;  %s193_s3 = inlined_call_operand.hbm [shape: f32[3,128], index: 3, kind: output, shape index: {}]  }
   0x1   :  { %9 = vsyncpa [#allocation3], 0 }
   0x2   :  { %10 = vsyncpa [#allocation4], 0  ;;  %s68_s14 = scalar_lea.hbm %s190_s0, 16 }
   0x3   :  { %p69_p0 = scmp.ne.s32.totalorder %s190_s0, %s68_s14  ;;  %p72_p1 = scmp.lt.u32.totalorder %s68_s14, %s190_s0 }
   0x5   :  { %p74_p2 = pnand %p72_p1, %p69_p0 }
   0x7   :  { %77 = shalt.err (!%p74_p2)
}
   0x8   :  { %s128_s19 = smov [#allocation2]   ;;  %s129_s22 = smov [#allocation6]  }
   0x9   :  { %18 = dma.hbm_to_smem %s190_s0, 16, %s128_s19, [#allocation5]  }
   0xa   :  { %s25_s23 = sshll.u32 %s129_s22, 4  ;;  %s78_s26 = scalar_lea.hbm %s191_s1, 64  ;;  %s26_s23 = int_to_ptr.vmem [resolvable:$true] %s25_s23 }
   0xb   :  { %p79_p3 = scmp.ne.s32.totalorder %s191_s1, %s78_s26  ;;  %p82_p4 = scmp.lt.u32.totalorder %s78_s26, %s191_s1 }
   0xd   :  { %p84_p5 = pnand %p82_p4, %p79_p3 }
   0xf   :  { %87 = shalt.err (!%p84_p5)
}
  0x10   :  { %s88_s4 = scalar_lea.vmem %s26_s23, 64  ;;  %p93_p7 = scmp.lt.s32.totalorder %s26_s23, %s26_s23 }
  0x11   :  { %p89_p6 = scmp.ne.s32.totalorder %s26_s23, %s88_s4  ;;  %p94_p8 = scmp.lt.s32.totalorder %s88_s4, %s88_s4 }
  0x13   :  { %p95_p9 = por %p94_p8, %p93_p7 }
  0x15   :  { %p96_p10 = pnand %p95_p9, %p89_p6 }
  0x17   :  { %99 = shalt.err (!%p96_p10)
}
  0x18   :  { %28 = dma.hbm_to_vmem [thread:$0]  %s191_s1, 64, %s26_s23, [#allocation3]  }
  0x19   :  { %122 = dma.done.wait [#allocation5], 16  }
  0x1a   :  { %123 = vsyncadd [#allocation5], 4294967280 }
  0x1b   :  { %124 = dma.done.wait [#allocation3], 64  }
  0x1c   :  { %125 = vsyncadd [#allocation3], 4294967232 }
  0x1d   :  { %37 = sfence }
  0x1e   :  { %s38_s6 = sld [smem:[#allocation2]]  ;;  %s64_s7 = sld [smem:[#allocation2 + $0x1]]  ;;  %v40_v0 = vld [vmem:[#allocation6] sm:$0x7]  ;;  %v41_v1 = vld [vmem:[%s192_s2] sm:$0x7] }
  0x1f   :  { %s130_s10 = smov [#allocation7]  }
  0x20   :  { %s54_s11 = sshll.u32 %s130_s10, 4  ;;  %s55_s11 = int_to_ptr.vmem [resolvable:$true] %s54_s11 }
  0x21   :  { %s100_s1 = scalar_lea.vmem %s55_s11, 64  ;;  %p105_p12 = scmp.lt.s32.totalorder %s55_s11, %s55_s11 }
  0x22   :  { %p101_p11 = scmp.ne.s32.totalorder %s55_s11, %s100_s1  ;;  %p106_p13 = scmp.lt.s32.totalorder %s100_s1, %s100_s1 }
  0x24   :  { %v42_v2 = vstv %s38_s6  ;;  %v44_v3 = vstv %s64_s7  ;;  %p107_p0 = por %p106_p13, %p105_p12 }
  0x25   :  { %v43_v4 = vmul.f32 %v42_v2, %v40_v0  ;;  %v45_v5 = vmul.f32 %v44_v3, %v41_v1 }
  0x26   :  { %p108_p1 = pnand %p107_p0, %p101_p11 }
  0x27   :  { %v46_v6 = vadd.f32 %v45_v5, %v43_v4 }
  0x29   :  { %47 = vst [vmem:[#allocation7] sm:$0x7] %v46_v6 }
  0x2a   :  { %111 = shalt.err (!%p108_p1)
}
  0x2b   :  { %s112_s2 = scalar_lea.hbm %s193_s3, 64 }
  0x2c   :  { %p113_p2 = scmp.ne.s32.totalorder %s193_s3, %s112_s2  ;;  %p116_p3 = scmp.lt.u32.totalorder %s112_s2, %s193_s3 }
  0x2e   :  { %p118_p4 = pnand %p116_p3, %p113_p2 }
  0x30   :  { %121 = shalt.err (!%p118_p4)
}
  0x31   :  { %57 = dma.vmem_to_hbm [thread:$0]  %s55_s11, 64, %s193_s3, [#allocation4]  }
  0x32   :  { %126 = dma.done.wait [#allocation4], 64  }
  0x33   :  { %127 = vsyncadd [#allocation4], 4294967232 }
  0x34   :  { %61 = vsyncpa [#allocation3], 1 }
  0x35   :  { %62 = vsyncpa [#allocation4], 1 }
  0x36   :  { %63 = vsyncpa [#allocation5], 1 }

</bundles_post_ra>
